<compile_context>
chip_gen: v6e
topology: v6e:2x2x1
jax: 0.10.0
libtpu: 0.0.40
codegen_flags: <defaults>
</compile_context>

<pallas_src>
import jax
import jax.numpy as jnp
from jax.experimental import pallas as pl
from jax.experimental.pallas import tpu as pltpu


def _round_up(a: int, b: int) -> int:
    return ((a + b - 1) // b) * b


def _cdiv(a: int, b: int) -> int:
    return (a + b - 1) // b


def qnetwork_kernel(x_ref, w1_ref, b1_ref, w2_ref, b2_ref, w3_ref, b3_ref, o_ref):
    # One TM-row batch tile.  All three matmuls hit the MXU with f32
    # accumulation; bias-add / ReLU stay f32 on the VPU; intermediates never
    # leave VMEM.  Layer-1's K=8 wastes MXU lanes but the kernel is
    # DMA/overhead-bound, so that is irrelevant.
    mm_dtype = w1_ref.dtype

    x = x_ref[...]
    h1 = jnp.dot(x, w1_ref[...], preferred_element_type=jnp.float32) + b1_ref[...]
    h1 = jnp.maximum(h1, 0.0).astype(mm_dtype)

    h2 = jnp.dot(h1, w2_ref[...], preferred_element_type=jnp.float32) + b2_ref[...]
    h2 = jnp.maximum(h2, 0.0).astype(mm_dtype)

    out = jnp.dot(h2, w3_ref[...], preferred_element_type=jnp.float32) + b3_ref[...]
    o_ref[...] = out.astype(o_ref.dtype)  # narrow (out_dim-wide) masked store


def prepare_params(params, matmul_dtype=jnp.bfloat16):
    """One-time parameter preparation (hoist out of the per-call path):
    weights -> matmul dtype (bf16 by default on all TPU generations),
    biases  -> f32 row vectors for the VPU epilogue."""
    return {
        "w1": params["w1"].astype(matmul_dtype),
        "w2": params["w2"].astype(matmul_dtype),
        "w3": params["w3"].astype(matmul_dtype),
        "b1": params["b1"].reshape(1, -1).astype(jnp.float32),
        "b2": params["b2"].reshape(1, -1).astype(jnp.float32),
        "b3": params["b3"].reshape(1, -1).astype(jnp.float32),
    }


def qnetwork_forward(x, prepared, *, tile_m=4096):
    """x: [B, input_dim] float32.  prepared: output of prepare_params()."""
    w1, b1 = prepared["w1"], prepared["b1"]
    w2, b2 = prepared["w2"], prepared["b2"]
    w3, b3 = prepared["w3"], prepared["b3"]

    B, in_dim = x.shape
    hid = w1.shape[1]
    out_dim = w3.shape[1]
    mm_dtype = w1.dtype
    itemsize = jnp.dtype(mm_dtype).itemsize
    row_align = 8 if itemsize >= 4 else 16  # sublane packing: f32 -> 8, bf16 -> 16

    # ---- batch tiling: sublane-dense rows, big tiles, >=2 tiles when possible ----
    b_rounded = _round_up(B, row_align)
    tm = min(tile_m, b_rounded)
    if (b_rounded // tm) < 2 and b_rounded >= 2 * row_align:
        # keep at least two grid steps so the "parallel" batch axis can shard
        # across v7x's two TensorCores
        tm = _round_up(_cdiv(b_rounded, 2), row_align)
    grid_m = _cdiv(b_rounded, tm)
    b_pad = grid_m * tm

    x_p = x.astype(mm_dtype)
    if b_pad != B:
        x_p = jnp.zeros((b_pad, in_dim), mm_dtype).at[:B, :].set(x_p)

    # ---- VMEM budget: x/out tiles double-buffered, resident weights counted once ----
    x_tile = tm * in_dim * itemsize
    out_tile = tm * out_dim * 4
    weight_bytes = (in_dim * hid + hid * hid + hid * out_dim) * itemsize \
        + (2 * hid + out_dim) * 4
    act_bytes = 2 * tm * hid * (4 + itemsize)  # f32 + mm_dtype copies of h1/h2
    vmem_bytes = 2 * (x_tile + out_tile) + weight_bytes + act_bytes + (4 << 20)
    vmem_bytes = int(min(max(vmem_bytes, 32 << 20), 60 << 20))

    flops = 2 * b_pad * (in_dim * hid + hid * hid + hid * out_dim)
    bytes_accessed = int(b_pad * in_dim * itemsize + weight_bytes + b_pad * out_dim * 4)

    out = pl.pallas_call(
        qnetwork_kernel,
        out_shape=jax.ShapeDtypeStruct((b_pad, out_dim), jnp.float32),
        grid=(grid_m,),
        in_specs=[
            pl.BlockSpec((tm, in_dim), lambda i: (i, 0)),    # streamed per batch tile
            pl.BlockSpec((in_dim, hid), lambda i: (0, 0)),   # weights/biases resident
            pl.BlockSpec((1, hid), lambda i: (0, 0)),
            pl.BlockSpec((hid, hid), lambda i: (0, 0)),
            pl.BlockSpec((1, hid), lambda i: (0, 0)),
            pl.BlockSpec((hid, out_dim), lambda i: (0, 0)),
            pl.BlockSpec((1, out_dim), lambda i: (0, 0)),
        ],
        out_specs=pl.BlockSpec((tm, out_dim), lambda i: (i, 0)),
        compiler_params=pltpu.CompilerParams(
            dimension_semantics=("parallel",),   # shard batch tiles across TCs (v7x)
            vmem_limit_bytes=vmem_bytes,
        ),
        cost_estimate=pl.CostEstimate(
            flops=flops, transcendentals=0, bytes_accessed=bytes_accessed),
    )(x_p, w1, b1, w2, b2, w3, b3)

    if b_pad != B:
        out = out[:B]    # only batch padding left to trim (cheap: B x out_dim)
    return out


def init_params(key, input_dim, hidden_dim, output_dim):
    """Deterministic init mimicking nn.Linear's default (uniform +/- 1/sqrt(fan_in))."""
    ks = jax.random.split(key, 6)

    def linear(kw, kb, fan_in, fan_out):
        bound = 1.0 / jnp.sqrt(jnp.float32(fan_in))
        w = jax.random.uniform(kw, (fan_in, fan_out), jnp.float32, -bound, bound)
        b = jax.random.uniform(kb, (1, fan_out), jnp.float32, -bound, bound)
        return w, b

    w1, b1 = linear(ks[0], ks[1], input_dim, hidden_dim)
    w2, b2 = linear(ks[2], ks[3], hidden_dim, hidden_dim)
    w3, b3 = linear(ks[4], ks[5], hidden_dim, output_dim)
    return {"w1": w1, "b1": b1, "w2": w2, "b2": b2, "w3": w3, "b3": b3}


def reference_forward(x, p, matmul_dtype=jnp.float32):
    """Pure-JAX reference with the same operand-dtype / f32-accumulate policy."""
    def mm(a, w):
        return jnp.dot(a.astype(matmul_dtype), w.astype(matmul_dtype),
                       preferred_element_type=jnp.float32)
    h1 = jnp.maximum(mm(x, p["w1"]) + p["b1"], 0.0)
    h2 = jnp.maximum(mm(h1, p["w2"]) + p["b2"], 0.0)
    return mm(h2, p["w3"]) + p["b3"]


if __name__ == "__main__":
    key = jax.random.PRNGKey(0)
    k_param, k_x, k_xbig = jax.random.split(key, 3)

    batch = 2
    input_dim = 8     # small state vector (CartPole-like)
    hidden_dim = 128  # fixed by the module definition
    output_dim = 4    # number of discrete actions

    params = init_params(k_param, input_dim, hidden_dim, output_dim)
    x = jax.random.normal(k_x, (batch, input_dim), dtype=jnp.float32)

    # Parameter prep happens ONCE, outside the forward path.
    params_bf16 = prepare_params(params, jnp.bfloat16)
    params_f32 = prepare_params(params, jnp.float32)

    # 1) default path: bf16 matmul operands on all chips, f32 accumulation.
    out_bf16 = jax.block_until_ready(qnetwork_forward(x, params_bf16))
    ref_bf16 = reference_forward(x, params, matmul_dtype=jnp.bfloat16)
    assert out_bf16.shape == (batch, output_dim), out_bf16.shape
    assert jnp.allclose(out_bf16, ref_bf16, atol=2e-2, rtol=2e-2), "bf16 mismatch vs reference"

    # 2) pure-f32 operand path (exactness check against the f32 reference).
    out_f32 = jax.block_until_ready(qnetwork_forward(x, params_f32))
    ref_f32 = reference_forward(x, params, matmul_dtype=jnp.float32)
    assert jnp.allclose(out_f32, ref_f32, atol=1e-4, rtol=1e-4), "f32 mismatch vs reference"

    # 3) multi-tile batch grid path (padded last tile, resident weights, >=2 tiles).
    big_b = 1030
    xb = jax.random.normal(k_xbig, (big_b, input_dim), dtype=jnp.float32)
    out_big = jax.block_until_ready(qnetwork_forward(xb, params_bf16))
    ref_big = reference_forward(xb, params, matmul_dtype=jnp.bfloat16)
    assert out_big.shape == (big_b, output_dim), out_big.shape
    assert jnp.allclose(out_big, ref_big, atol=2e-2, rtol=2e-2), "batched mismatch vs reference"

    print("KERNEL_OK")
</pallas_src>

<mosaic_0001>
module attributes {stable_mosaic.version = 11 : i64} {
  func.func @qnetwork_kernel(%arg0: i32, %arg1: memref<16x8xbf16, #tpu.memory_space<vmem>>, %arg2: memref<8x128xbf16, #tpu.memory_space<vmem>>, %arg3: memref<1x128xf32, #tpu.memory_space<vmem>>, %arg4: memref<128x128xbf16, #tpu.memory_space<vmem>>, %arg5: memref<1x128xf32, #tpu.memory_space<vmem>>, %arg6: memref<128x4xbf16, #tpu.memory_space<vmem>>, %arg7: memref<1x4xf32, #tpu.memory_space<vmem>>, %arg8: memref<16x4xf32, #tpu.memory_space<vmem>>) attributes {dimension_semantics = [#tpu.dimension_semantics<parallel>], iteration_bounds = array<i64: 1>, scalar_prefetch = 0 : i64, scratch_operands = 0 : i64, tpu.core_type = #tpu.core_type<tc>, window_params = [{transform_indices = @transform_0, window_bounds = array<i64: 16, 8>}, {pipeline_mode = #tpu.pipeline_mode<synchronous>, transform_indices = @transform_1, window_bounds = array<i64: 8, 128>}, {pipeline_mode = #tpu.pipeline_mode<synchronous>, transform_indices = @transform_2, window_bounds = array<i64: 1, 128>}, {pipeline_mode = #tpu.pipeline_mode<synchronous>, transform_indices = @transform_3, window_bounds = array<i64: 128, 128>}, {pipeline_mode = #tpu.pipeline_mode<synchronous>, transform_indices = @transform_4, window_bounds = array<i64: 1, 128>}, {pipeline_mode = #tpu.pipeline_mode<synchronous>, transform_indices = @transform_5, window_bounds = array<i64: 128, 4>}, {pipeline_mode = #tpu.pipeline_mode<synchronous>, transform_indices = @transform_6, window_bounds = array<i64: 1, 4>}, {transform_indices = @transform_7, window_bounds = array<i64: 16, 4>}]} {
    %c0 = arith.constant 0 : index
    %c0_0 = arith.constant 0 : index
    %0 = vector.load %arg1[%c0, %c0_0] : memref<16x8xbf16, #tpu.memory_space<vmem>>, vector<16x8xbf16>
    %c0_1 = arith.constant 0 : index
    %c0_2 = arith.constant 0 : index
    %1 = vector.load %arg2[%c0_1, %c0_2] : memref<8x128xbf16, #tpu.memory_space<vmem>>, vector<8x128xbf16>
    %cst = arith.constant dense<0.000000e+00> : vector<16x128xf32>
    %2 = tpu.matmul %0, %1, %cst {dimension_numbers = #tpu.dot_dimension_numbers<[1], [0], [0], [1], [0, 0, 1, 1], [], []>} : vector<16x8xbf16>, vector<8x128xbf16>, vector<16x128xf32> -> vector<16x128xf32>
    %c0_3 = arith.constant 0 : index
    %c0_4 = arith.constant 0 : index
    %3 = vector.load %arg3[%c0_3, %c0_4] : memref<1x128xf32, #tpu.memory_space<vmem>>, vector<1x128xf32>
    %4 = vector.broadcast %3 : vector<1x128xf32> to vector<16x128xf32>
    %5 = arith.addf %2, %4 : vector<16x128xf32>
    %cst_5 = arith.constant 0.000000e+00 : f32
    %6 = vector.broadcast %cst_5 : f32 to vector<16x128xf32>
    %7 = arith.maximumf %5, %6 : vector<16x128xf32>
    %8 = arith.truncf %7 : vector<16x128xf32> to vector<16x128xbf16>
    %c0_6 = arith.constant 0 : index
    %c0_7 = arith.constant 0 : index
    %9 = vector.load %arg4[%c0_6, %c0_7] : memref<128x128xbf16, #tpu.memory_space<vmem>>, vector<128x128xbf16>
    %cst_8 = arith.constant dense<0.000000e+00> : vector<16x128xf32>
    %10 = tpu.matmul %8, %9, %cst_8 {dimension_numbers = #tpu.dot_dimension_numbers<[1], [0], [0], [1], [0, 0, 1, 1], [], []>} : vector<16x128xbf16>, vector<128x128xbf16>, vector<16x128xf32> -> vector<16x128xf32>
    %c0_9 = arith.constant 0 : index
    %c0_10 = arith.constant 0 : index
    %11 = vector.load %arg5[%c0_9, %c0_10] : memref<1x128xf32, #tpu.memory_space<vmem>>, vector<1x128xf32>
    %12 = vector.broadcast %11 : vector<1x128xf32> to vector<16x128xf32>
    %13 = arith.addf %10, %12 : vector<16x128xf32>
    %cst_11 = arith.constant 0.000000e+00 : f32
    %14 = vector.broadcast %cst_11 : f32 to vector<16x128xf32>
    %15 = arith.maximumf %13, %14 : vector<16x128xf32>
    %16 = arith.truncf %15 : vector<16x128xf32> to vector<16x128xbf16>
    %c0_12 = arith.constant 0 : index
    %c0_13 = arith.constant 0 : index
    %17 = vector.load %arg6[%c0_12, %c0_13] : memref<128x4xbf16, #tpu.memory_space<vmem>>, vector<128x4xbf16>
    %cst_14 = arith.constant dense<0.000000e+00> : vector<16x4xf32>
    %18 = tpu.matmul %16, %17, %cst_14 {dimension_numbers = #tpu.dot_dimension_numbers<[1], [0], [0], [1], [0, 0, 1, 1], [], []>} : vector<16x128xbf16>, vector<128x4xbf16>, vector<16x4xf32> -> vector<16x4xf32>
    %c0_15 = arith.constant 0 : index
    %c0_16 = arith.constant 0 : index
    %19 = vector.load %arg7[%c0_15, %c0_16] : memref<1x4xf32, #tpu.memory_space<vmem>>, vector<1x4xf32>
    %20 = vector.broadcast %19 : vector<1x4xf32> to vector<16x4xf32>
    %21 = arith.addf %18, %20 : vector<16x4xf32>
    %c0_17 = arith.constant 0 : index
    %c0_18 = arith.constant 0 : index
    %22 = vector.load %arg8[%c0_17, %c0_18] : memref<16x4xf32, #tpu.memory_space<vmem>>, vector<16x4xf32>
    tpu.vector_store %arg8[%c0_17, %c0_18], %21 {strides = array<i32>} : memref<16x4xf32, #tpu.memory_space<vmem>>, vector<16x4xf32>,
    return
  }
  func.func @transform_0(%arg0: i32) -> (i32, i32) {
    %c0_i32 = arith.constant 0 : i32
    %c0_i32_0 = arith.constant 0 : i32
    return %arg0, %c0_i32 : i32, i32
  }
  func.func @transform_1(%arg0: i32) -> (i32, i32) {
    %c0_i32 = arith.constant 0 : i32
    %c0_i32_0 = arith.constant 0 : i32
    %c0_i32_1 = arith.constant 0 : i32
    return %c0_i32, %c0_i32_0 : i32, i32
  }
  func.func @transform_2(%arg0: i32) -> (i32, i32) {
    %c0_i32 = arith.constant 0 : i32
    %c0_i32_0 = arith.constant 0 : i32
    %c0_i32_1 = arith.constant 0 : i32
    return %c0_i32, %c0_i32_0 : i32, i32
  }
  func.func @transform_3(%arg0: i32) -> (i32, i32) {
    %c0_i32 = arith.constant 0 : i32
    %c0_i32_0 = arith.constant 0 : i32
    %c0_i32_1 = arith.constant 0 : i32
    return %c0_i32, %c0_i32_0 : i32, i32
  }
  func.func @transform_4(%arg0: i32) -> (i32, i32) {
    %c0_i32 = arith.constant 0 : i32
    %c0_i32_0 = arith.constant 0 : i32
    %c0_i32_1 = arith.constant 0 : i32
    return %c0_i32, %c0_i32_0 : i32, i32
  }
  func.func @transform_5(%arg0: i32) -> (i32, i32) {
    %c0_i32 = arith.constant 0 : i32
    %c0_i32_0 = arith.constant 0 : i32
    %c0_i32_1 = arith.constant 0 : i32
    return %c0_i32, %c0_i32_0 : i32, i32
  }
  func.func @transform_6(%arg0: i32) -> (i32, i32) {
    %c0_i32 = arith.constant 0 : i32
    %c0_i32_0 = arith.constant 0 : i32
    %c0_i32_1 = arith.constant 0 : i32
    return %c0_i32, %c0_i32_0 : i32, i32
  }
  func.func @transform_7(%arg0: i32) -> (i32, i32) {
    %c0_i32 = arith.constant 0 : i32
    %c0_i32_0 = arith.constant 0 : i32
    return %arg0, %c0_i32 : i32, i32
  }
}

</mosaic_0001>

<bundles_post_ra>
// kernel: tpu_custom_call.1
= control target key start
LH: loop header
LB: loop body
LE: loop exit
PB: predicated region body
PF: predicated region fallthrough
CT: control target
= control target key end

     0   :  { %vm46_vm0 = vcmask 1043456   ;;  %v434_v0 = vmov 0.0   ;;  %vm435_vm1 = vmmov 0   ;;  %vm42_vm2 = vcmask 64512   ;;  %s565_s1 = inlined_call_operand.vmem [shape: bf16[8,128], index: 1, kind: input, shape index: {}]   ;;  %s566_s0 = inlined_call_operand.vmem [shape: bf16[16,8], index: 0, kind: input, shape index: {}]   ;;  %s567_s3 = inlined_call_operand.vmem [shape: bf16[128,128], index: 3, kind: input, shape index: {}]   ;;  %s568_s5 = inlined_call_operand.vmem [shape: bf16[128,4], index: 5, kind: input, shape index: {}]   ;;  %s569_s2 = inlined_call_operand.vmem [shape: f32[1,128], index: 2, kind: input, shape index: {}]   ;;  %s570_s4 = inlined_call_operand.vmem [shape: f32[1,128], index: 4, kind: input, shape index: {}]   ;;  %s571_s6 = inlined_call_operand.vmem [shape: f32[1,4], index: 6, kind: input, shape index: {}]   ;;  %s572_s7 = inlined_call_operand.vmem [shape: f32[16,4], index: 7, kind: output, shape index: {}]  }
   0x1   :  { %369 = vmatprep.subr.bf16.mxu0 %v434_v0  ;;  %v29_v1 = vld [vmem:[%s565_s1] sm:$0xf]  ;;  %371 = vmatprep.mubr.msk.bf16.mxu0 %vm435_vm1, %v434_v0  ;;  %v418_v4 = vld [vmem:[%s567_s3 + $0x38] sm:$0xff]   ;;  %v419_v5 = vld [vmem:[%s567_s3 + $0x30] sm:$0xff]   ;;  %vm321_vm3 = vcmask 31744  }
   0x2   :  { %v48_v2 = vsel %vm46_vm0, %v29_v1, 0  ;;  %v417_v3 = vld [vmem:[%s566_s0] sm:$0xff]   ;;  %375 = vmatprep.subr.bf16.mxu1 %v434_v0  ;;  %391 = vmatprep.mubr.msk.bf16.mxu1 %vm435_vm1, %v434_v0  ;;  %v420_v6 = vld [vmem:[%s567_s3 + $0x28] sm:$0xff]   ;;  %v422_v8 = vld [vmem:[%s567_s3 + $0x18] sm:$0xff]  }
   0x3   :  { %370 = vmatpush3.bf16.msra.mxu0 %v48_v2  ;;  %376 = vmatpush3.bf16.msra.mxu1 %v418_v4  ;;  %v421_v7 = vld [vmem:[%s567_s3 + $0x20] sm:$0xff]   ;;  %v423_v9 = vld [vmem:[%s567_s3 + $0x10] sm:$0xff]   ;;  %v424_v10 = vld [vmem:[%s567_s3 + $0x8] sm:$0xff]  }
   0x4   :  { %395 = vmatprep.subr.bf16.mxu0 %v434_v0  ;;  %377 = vmatprep.subr.bf16.mxu1 %v434_v0  ;;  %v425_v11 = vld [vmem:[%s567_s3] sm:$0xff]   ;;  %v426_v12 = vld [vmem:[%s568_s5 + $0x38] sm:$0xff]   ;;  %v427_v13 = vld [vmem:[%s568_s5 + $0x30] sm:$0xff]  }
   0x5   :  { %v428_v14 = vld [vmem:[%s568_s5 + $0x28] sm:$0xff]   ;;  %v429_v15 = vld [vmem:[%s568_s5 + $0x20] sm:$0xff]   ;;  %v430_v16 = vld [vmem:[%s568_s5 + $0x18] sm:$0xff]  }
   0x6   :  { %372 = vmatmul.mubr.msk.bf16.vlgmr.msra.gmra.mxu0 %vm42_vm2, %v417_v3  ;;  %v328_v17 = vld [vmem:[%s569_s2] ss:$0 sm:$0xff]  ;;  %v431_v27 = vld [vmem:[%s568_s5 + $0x10] sm:$0xff]   ;;  %v432_v28 = vld [vmem:[%s568_s5 + $0x8] sm:$0xff]  }
   0x7   :  { %411 = vmatprep.mubr.msk.bf16.mxu0 %vm435_vm1, %v434_v0  ;;  %378 = vmatpush3.bf16.msra.mxu1 %v419_v5  ;;  %v433_v29 = vld [vmem:[%s568_s5] sm:$0xff]  }
   0x8   :  { %379 = vmatprep.subr.bf16.mxu1 %v434_v0  ;;  %396 = vmatpush3.bf16.msra.mxu0 %v426_v12  ;;  %v331_v30 = vld [vmem:[%s570_s4] ss:$0 sm:$0xff] }
   0x9   :  { %397 = vmatprep.subr.bf16.mxu0 %v434_v0  ;;  %v340_v40 = vld [vmem:[%s571_s6] ss:$0 sm:$0xff] }
   0xb   :  { %380 = vmatpush3.bf16.msra.mxu1 %v420_v6 }
   0xc   :  { %381 = vmatprep.subr.bf16.mxu1 %v434_v0  ;;  %398 = vmatpush3.bf16.msra.mxu0 %v427_v13 }
   0xd   :  { %399 = vmatprep.subr.bf16.mxu0 %v434_v0 }
   0xf   :  { %382 = vmatpush3.bf16.msra.mxu1 %v421_v7 }
  0x10   :  { %383 = vmatprep.subr.bf16.mxu1 %v434_v0  ;;  %400 = vmatpush3.bf16.msra.mxu0 %v428_v14 }
  0x11   :  { %401 = vmatprep.subr.bf16.mxu0 %v434_v0 }
  0x13   :  { %384 = vmatpush3.bf16.msra.mxu1 %v422_v8 }
  0x14   :  { %385 = vmatprep.subr.bf16.mxu1 %v434_v0  ;;  %402 = vmatpush3.bf16.msra.mxu0 %v429_v15 }
  0x15   :  { %403 = vmatprep.subr.bf16.mxu0 %v434_v0 }
  0x17   :  { %386 = vmatpush3.bf16.msra.mxu1 %v423_v9 }
  0x18   :  { %387 = vmatprep.subr.bf16.mxu1 %v434_v0  ;;  %404 = vmatpush3.bf16.msra.mxu0 %v430_v16 }
  0x19   :  { %405 = vmatprep.subr.bf16.mxu0 %v434_v0 }
  0x1b   :  { %388 = vmatpush3.bf16.msra.mxu1 %v424_v10 }
  0x1c   :  { %389 = vmatprep.subr.bf16.mxu1 %v434_v0  ;;  %406 = vmatpush3.bf16.msra.mxu0 %v431_v27 }
  0x1d   :  { %407 = vmatprep.subr.bf16.mxu0 %v434_v0 }
  0x1f   :  { %390 = vmatpush3.bf16.msra.mxu1 %v425_v11 }
  0x20   :  { %408 = vmatpush3.bf16.msra.mxu0 %v432_v28 }
  0x21   :  { %409 = vmatprep.subr.bf16.mxu0 %v434_v0 }
  0x24   :  { %410 = vmatpush3.bf16.msra.mxu0 %v433_v29 }
  0xc6   :  { %v84_v18 = vpop.f32.mrf.mxu0 }
  0xc7   :  { %v85_v20 = vadd.f32 %v328_v17, %v84_v18 }
  0xc8   :  { %v373_v19 = vpop.f32.mrf.mxu0 }
  0xc9   :  { %v91_v24 = vmax.f32 %v85_v20, 0.0 }
  0xca   :  { %v87_v21 = vpop.f32.mrf.mxu0 }
  0xcb   :  { %v88_v22 = vadd.f32 %v328_v17, %v87_v21 }
  0xcc   :  { %v374_v23 = vpop.f32.mrf.mxu0 }
  0xcd   :  { %v92_v25 = vmax.f32 %v88_v22, 0.0 }
  0xcf   :  { %v93_v26 = vpack.c.bf16 %v92_v25, %v91_v24 }
  0xd1   :  { %392 = vmatmul.mubr.bf16.vlgmr.msra.gmra.mxu1 %v93_v26 }
 0x191   :  { %v199_v31 = vpop.f32.mrf.mxu1 }
 0x192   :  { %v200_v33 = vadd.f32 %v331_v30, %v199_v31 }
 0x193   :  { %v393_v32 = vpop.f32.mrf.mxu1 }
 0x194   :  { %v206_v37 = vmax.f32 %v200_v33, 0.0 }
 0x195   :  { %v202_v34 = vpop.f32.mrf.mxu1 }
 0x196   :  { %v203_v35 = vadd.f32 %v331_v30, %v202_v34 }
 0x197   :  { %v394_v36 = vpop.f32.mrf.mxu1 }
 0x198   :  { %v207_v38 = vmax.f32 %v203_v35, 0.0 }
 0x19a   :  { %v208_v39 = vpack.c.bf16 %v207_v38, %v206_v37 }
 0x19c   :  { %412 = vmatmul.mubr.bf16.vlgmr.msra.gmra.mxu0 %v208_v39 }
 0x25c   :  { %v314_v41 = vpop.f32.mrf.mxu0 }
 0x25d   :  { %v315_v42 = vadd.f32 %v340_v40, %v314_v41 }
 0x25e   :  { %v413_v43 = vpop.f32.mrf.mxu0 }
 0x25f   :  { %322 = vst.msk [vmem:[%s572_s7] sm:$0xff] %vm321_vm3, %v315_v42 }
 0x260   :  { %v317_v44 = vpop.f32.mrf.mxu0 }
 0x261   :  { %v318_v45 = vadd.f32 %v340_v40, %v317_v44 }
 0x262   :  { %v414_v46 = vpop.f32.mrf.mxu0 }
 0x263   :  { %323 = vst.msk [vmem:[%s572_s7 + $0x8] sm:$0xff] %vm321_vm3, %v318_v45 }

</bundles_post_ra>
